<compile_context>
chip_gen: v6e
topology: v6e:2x2x1
jax: 0.10.0
libtpu: 0.0.40
codegen_flags: <defaults>
</compile_context>

<pallas_src>
import functools

import jax
import jax.numpy as jnp
from jax import lax
from jax.experimental import pallas as pl
from jax.experimental.pallas import tpu as pltpu


_TARGET_BLOCK_BYTES = 4 << 20   # ~4 MiB of logits per grid step (amortize ~0.35us/step)
_VMEM_BUDGET_BYTES = 24 << 20   # headroom under the 32 MiB scoped-VMEM request
_VMEM_LIMIT_BYTES = 32 << 20    # <= default scoped limit on v6e/v7x, raises v5e's 16 MiB
_MIN_PALLAS_PIXELS = 4096       # below this a pallas_call is pure launch overhead


def _ce_partial_kernel(logits_ref, labels_ref, out_ref, *, block_rows, total_rows):
    """Per-block partial (nll_sum, valid_count) of softmax cross-entropy.

    Block layout (dense, native NCHW order; pixels viewed as (rows, 128 lanes)):
      logits_ref : (1, C, tq, 128)   any float dtype
      labels_ref : (1, tq, 128)      any integer dtype (cast in-kernel)
      out_ref    : (1, 1, 8, 128) f32; sublane 0 = nll_sum, sublanes 1..7 = count
    """
    j = pl.program_id(1)
    num_classes = logits_ref.shape[1]
    tq = logits_ref.shape[2]

    labels = labels_ref[0].astype(jnp.int32)                        # (tq, 128)

    # pass 1: per-pixel max over classes, in the native dtype (elementwise VPU)
    m = logits_ref[0, 0]
    for c in range(1, num_classes):
        m = jnp.maximum(m, logits_ref[0, c])
    m = m.astype(jnp.float32)                                       # (tq, 128)

    # pass 2: sum_c exp(x_c - m)  and  (x[label] - m); logp is never materialized
    sum_exp = jnp.zeros((tq, 128), jnp.float32)
    x_label = jnp.zeros((tq, 128), jnp.float32)
    for c in range(num_classes):
        xc = logits_ref[0, c].astype(jnp.float32) - m
        sum_exp = sum_exp + jnp.exp(xc)
        x_label = x_label + jnp.where(labels == c, xc, 0.0)

    # validity: ignore-labels (<0 e.g. -1/-100, or >= C) and the partial tail
    # block when block_rows does not divide the pixel-row count.
    row = lax.broadcasted_iota(jnp.int32, (tq, 128), 0)
    in_bounds = (j * block_rows + row) < total_rows
    in_range = jnp.logical_and(labels >= 0, labels < num_classes)
    valid = jnp.logical_and(in_range, in_bounds)

    # nll = (m + lse) - x[label]  ==  log(sum exp(x-m)) - (x[label] - m)
    nll = jnp.where(valid, jnp.log(sum_exp) - x_label, 0.0)         # (tq, 128)

    nll_sum = jnp.sum(nll)
    cnt_sum = jnp.sum(jnp.where(valid, 1.0, 0.0))                   # exact: < 2^24/block

    row8 = lax.broadcasted_iota(jnp.int32, (8, 128), 0)
    out_ref[0, 0] = jnp.where(row8 == 0, nll_sum, cnt_sum)


def _pick_row_tile(num_rows, num_classes, logit_itemsize, label_itemsize):
    """Row tile tq (pixels per block = tq*128) from a byte budget, not a lane cap."""
    rows_dma = _TARGET_BLOCK_BYTES // (num_classes * 128 * logit_itemsize)
    # VMEM per row of block: double-buffered logits + labels blocks plus ~8 f32
    # temporary row-planes created by the kernel body.
    per_row = 128 * (2 * num_classes * logit_itemsize + 2 * label_itemsize + 8 * 4)
    rows_vmem = _VMEM_BUDGET_BYTES // per_row
    tq = max(8, (min(rows_dma, rows_vmem) // 8) * 8)
    return min(tq, num_rows)


def _ce_mean_xla(logits_nchw, gt_nhw):
    """Fused-XLA path for tiny scales and P % 128 != 0 (same ignore semantics)."""
    num_classes = logits_nchw.shape[1]
    x = logits_nchw.astype(jnp.float32)
    gt = gt_nhw.astype(jnp.int32)
    m = jnp.max(x, axis=1, keepdims=True)
    lse = jnp.log(jnp.sum(jnp.exp(x - m), axis=1, keepdims=True)) + m     # (N,1,H,W)
    safe = jnp.clip(gt, 0, num_classes - 1)
    x_label = jnp.take_along_axis(x, safe[:, None], axis=1)[:, 0]         # (N,H,W)
    valid = jnp.logical_and(gt >= 0, gt < num_classes)
    nll = jnp.where(valid, lse[:, 0] - x_label, 0.0)
    return jnp.sum(nll) / jnp.sum(valid.astype(jnp.float32))


def cross_entropy_mean(logits_nchw: jax.Array, gt_nhw: jax.Array, *, row_tile=None):
    """F.cross_entropy(logits, gt, reduction='mean') for NCHW logits / NHW int gts."""
    N, C, H, W = logits_nchw.shape
    P = H * W
    if P % 128 != 0 or P < _MIN_PALLAS_PIXELS:
        # Tiny scales: pallas launch overhead dominates; XLA fuses this fine.
        # TODO(synk): in-kernel lane tail-mask for P % 128 != 0 instead of falling back.
        return _ce_mean_xla(logits_nchw, gt_nhw)

    Q = P // 128
    x = logits_nchw.reshape(N, C, Q, 128)      # free reshape, native NCHW order
    y = gt_nhw.reshape(N, Q, 128)              # labels keep their native HBM dtype

    if row_tile is None:
        tq = _pick_row_tile(Q, C, logits_nchw.dtype.itemsize, y.dtype.itemsize)
    else:
        tq = min(Q, max(8, (row_tile // 8) * 8))
    num_j = -(-Q // tq)

    kernel = functools.partial(_ce_partial_kernel, block_rows=tq, total_rows=Q)
    partials = pl.pallas_call(
        kernel,
        out_shape=jax.ShapeDtypeStruct((N, num_j, 8, 128), jnp.float32),
        grid=(N, num_j),
        in_specs=[
            pl.BlockSpec((1, C, tq, 128), lambda n, j: (n, 0, j, 0)),
            pl.BlockSpec((1, tq, 128), lambda n, j: (n, j, 0)),
        ],
        out_specs=pl.BlockSpec((1, 1, 8, 128), lambda n, j: (n, j, 0, 0)),
        compiler_params=pltpu.CompilerParams(
            # every block writes its own partial -> fully independent grid,
            # both axes shardable across v7x's two TensorCores.
            dimension_semantics=("parallel", "parallel"),
            vmem_limit_bytes=_VMEM_LIMIT_BYTES),
    )(x, y)

    nll_total = jnp.sum(partials[:, :, 0, 0])
    cnt_total = jnp.sum(partials[:, :, 1, 0])
    return nll_total / cnt_total


class DeepSupervisedLoss:
    """JAX/Pallas port of mlutils.losses.DeepSupervisedLoss."""

    def __init__(self, loss_fn, weights):
        self.loss_fn = loss_fn
        self.weights = weights

    def __call__(self, logits, gts, **kwargs):
        assert len(logits) == len(gts)
        assert len(logits) == len(self.weights)
        final_loss = jnp.float32(0.0)
        for logit, gt, weight in zip(logits, gts, self.weights):
            final_loss = final_loss + self.loss_fn(logit, gt, **kwargs) * weight
        return final_loss


def _reference_ce_mean(logits_nchw, gt_nhw):
    """Pure-JAX reference (masked mean, same ignore semantics) for validation."""
    x = jnp.transpose(logits_nchw, (0, 2, 3, 1)).astype(jnp.float32)
    num_classes = x.shape[-1]
    gt = gt_nhw.astype(jnp.int32)
    logp = jax.nn.log_softmax(x, axis=-1)
    safe = jnp.clip(gt, 0, num_classes - 1)
    nll = -jnp.take_along_axis(logp, safe[..., None], axis=-1)[..., 0]
    valid = jnp.logical_and(gt >= 0, gt < num_classes)
    return jnp.sum(jnp.where(valid, nll, 0.0)) / jnp.sum(valid.astype(jnp.float32))


if __name__ == "__main__":
    key = jax.random.PRNGKey(0)
    N, C = 2, 4
    scales = [64, 16, 8]                 # deep-supervision pyramid
    weights = [1.0, 0.5, 0.25]

    logits, gts = [], []
    for s in scales:
        key, k1, k2 = jax.random.split(key, 3)
        logits.append(jax.random.normal(k1, (N, C, s, s), dtype=jnp.float32))
        gts.append(jax.random.randint(k2, (N, s, s), 0, C, dtype=jnp.int32))

    # a few ignored labels (-1) in the full-res scale exercise the ignore mask
    gts[0] = gts[0].at[:, :2, :3].set(-1)

    ds_loss = DeepSupervisedLoss(cross_entropy_mean, weights)
    out = jax.block_until_ready(ds_loss(logits, gts))
    ref = sum(_reference_ce_mean(l, g) * w for l, g, w in zip(logits, gts, weights))
    assert jnp.allclose(out, ref, rtol=1e-4, atol=1e-4), (out, ref)

    # multi-block grid + partial tail block (row tile does not divide Q = 40)
    key, k1, k2 = jax.random.split(key, 3)
    l_tail = jax.random.normal(k1, (N, C, 40, 128), dtype=jnp.float32)
    g_tail = jax.random.randint(k2, (N, 40, 128), 0, C, dtype=jnp.int32)
    out_tail = jax.block_until_ready(cross_entropy_mean(l_tail, g_tail, row_tile=16))
    ref_tail = _reference_ce_mean(l_tail, g_tail)
    assert jnp.allclose(out_tail, ref_tail, rtol=1e-4, atol=1e-4), (out_tail, ref_tail)

    print("KERNEL_OK")
</pallas_src>

<mosaic_0001>
module attributes {stable_mosaic.version = 11 : i64} {
  func.func @_ce_partial_kernel(%arg0: i32, %arg1: i32, %arg2: memref<1x4x32x128xf32, #tpu.memory_space<vmem>>, %arg3: memref<1x32x128xi32, #tpu.memory_space<vmem>>, %arg4: memref<1x1x8x128xf32, #tpu.memory_space<vmem>>) attributes {dimension_semantics = [#tpu.dimension_semantics<parallel>, #tpu.dimension_semantics<parallel>], iteration_bounds = array<i64: 2, 1>, scalar_prefetch = 0 : i64, scratch_operands = 0 : i64, tpu.core_type = #tpu.core_type<tc>, window_params = [{transform_indices = @transform_0, window_bounds = array<i64: 1, 4, 32, 128>}, {transform_indices = @transform_1, window_bounds = array<i64: 1, 32, 128>}, {transform_indices = @transform_2, window_bounds = array<i64: 1, 1, 8, 128>}]} {
    %c0 = arith.constant 0 : index
    %c0_0 = arith.constant 0 : index
    %c0_1 = arith.constant 0 : index
    %0 = vector.load %arg3[%c0, %c0_0, %c0_1] : memref<1x32x128xi32, #tpu.memory_space<vmem>>, vector<1x32x128xi32>
    %1 = vector.shape_cast %0 : vector<1x32x128xi32> to vector<32x128xi32>
    %c0_2 = arith.constant 0 : index
    %c0_3 = arith.constant 0 : index
    %c0_4 = arith.constant 0 : index
    %c0_5 = arith.constant 0 : index
    %2 = vector.load %arg2[%c0_2, %c0_3, %c0_4, %c0_5] : memref<1x4x32x128xf32, #tpu.memory_space<vmem>>, vector<1x1x32x128xf32>
    %3 = vector.shape_cast %2 : vector<1x1x32x128xf32> to vector<32x128xf32>
    %c0_6 = arith.constant 0 : index
    %c1 = arith.constant 1 : index
    %c0_7 = arith.constant 0 : index
    %c0_8 = arith.constant 0 : index
    %4 = vector.load %arg2[%c0_6, %c1, %c0_7, %c0_8] : memref<1x4x32x128xf32, #tpu.memory_space<vmem>>, vector<1x1x32x128xf32>
    %5 = vector.shape_cast %4 : vector<1x1x32x128xf32> to vector<32x128xf32>
    %6 = arith.maximumf %3, %5 : vector<32x128xf32>
    %c0_9 = arith.constant 0 : index
    %c2 = arith.constant 2 : index
    %c0_10 = arith.constant 0 : index
    %c0_11 = arith.constant 0 : index
    %7 = vector.load %arg2[%c0_9, %c2, %c0_10, %c0_11] : memref<1x4x32x128xf32, #tpu.memory_space<vmem>>, vector<1x1x32x128xf32>
    %8 = vector.shape_cast %7 : vector<1x1x32x128xf32> to vector<32x128xf32>
    %9 = arith.maximumf %6, %8 : vector<32x128xf32>
    %c0_12 = arith.constant 0 : index
    %c3 = arith.constant 3 : index
    %c0_13 = arith.constant 0 : index
    %c0_14 = arith.constant 0 : index
    %10 = vector.load %arg2[%c0_12, %c3, %c0_13, %c0_14] : memref<1x4x32x128xf32, #tpu.memory_space<vmem>>, vector<1x1x32x128xf32>
    %11 = vector.shape_cast %10 : vector<1x1x32x128xf32> to vector<32x128xf32>
    %12 = arith.maximumf %9, %11 : vector<32x128xf32>
    %cst = arith.constant 0.000000e+00 : f32
    %13 = vector.broadcast %cst : f32 to vector<32x128xf32>
    %cst_15 = arith.constant 0.000000e+00 : f32
    %14 = vector.broadcast %cst_15 : f32 to vector<32x128xf32>
    %c0_16 = arith.constant 0 : index
    %c0_17 = arith.constant 0 : index
    %c0_18 = arith.constant 0 : index
    %c0_19 = arith.constant 0 : index
    %15 = vector.load %arg2[%c0_16, %c0_17, %c0_18, %c0_19] : memref<1x4x32x128xf32, #tpu.memory_space<vmem>>, vector<1x1x32x128xf32>
    %16 = vector.shape_cast %15 : vector<1x1x32x128xf32> to vector<32x128xf32>
    %17 = arith.subf %16, %12 : vector<32x128xf32>
    %18 = math.exp %17 : vector<32x128xf32>
    %19 = arith.addf %13, %18 : vector<32x128xf32>
    %c0_i32 = arith.constant 0 : i32
    %20 = vector.broadcast %c0_i32 : i32 to vector<32x128xi32>
    %21 = arith.cmpi eq, %1, %20 : vector<32x128xi32>
    %cst_20 = arith.constant 0.000000e+00 : f32
    %22 = vector.broadcast %cst_20 : f32 to vector<32x128xf32>
    %23 = arith.select %21, %17, %22 : vector<32x128xi1>, vector<32x128xf32>
    %24 = arith.addf %14, %23 : vector<32x128xf32>
    %c0_21 = arith.constant 0 : index
    %c1_22 = arith.constant 1 : index
    %c0_23 = arith.constant 0 : index
    %c0_24 = arith.constant 0 : index
    %25 = vector.load %arg2[%c0_21, %c1_22, %c0_23, %c0_24] : memref<1x4x32x128xf32, #tpu.memory_space<vmem>>, vector<1x1x32x128xf32>
    %26 = vector.shape_cast %25 : vector<1x1x32x128xf32> to vector<32x128xf32>
    %27 = arith.subf %26, %12 : vector<32x128xf32>
    %28 = math.exp %27 : vector<32x128xf32>
    %29 = arith.addf %19, %28 : vector<32x128xf32>
    %c1_i32 = arith.constant 1 : i32
    %30 = vector.broadcast %c1_i32 : i32 to vector<32x128xi32>
    %31 = arith.cmpi eq, %1, %30 : vector<32x128xi32>
    %cst_25 = arith.constant 0.000000e+00 : f32
    %32 = vector.broadcast %cst_25 : f32 to vector<32x128xf32>
    %33 = arith.select %31, %27, %32 : vector<32x128xi1>, vector<32x128xf32>
    %34 = arith.addf %24, %33 : vector<32x128xf32>
    %c0_26 = arith.constant 0 : index
    %c2_27 = arith.constant 2 : index
    %c0_28 = arith.constant 0 : index
    %c0_29 = arith.constant 0 : index
    %35 = vector.load %arg2[%c0_26, %c2_27, %c0_28, %c0_29] : memref<1x4x32x128xf32, #tpu.memory_space<vmem>>, vector<1x1x32x128xf32>
    %36 = vector.shape_cast %35 : vector<1x1x32x128xf32> to vector<32x128xf32>
    %37 = arith.subf %36, %12 : vector<32x128xf32>
    %38 = math.exp %37 : vector<32x128xf32>
    %39 = arith.addf %29, %38 : vector<32x128xf32>
    %c2_i32 = arith.constant 2 : i32
    %40 = vector.broadcast %c2_i32 : i32 to vector<32x128xi32>
    %41 = arith.cmpi eq, %1, %40 : vector<32x128xi32>
    %cst_30 = arith.constant 0.000000e+00 : f32
    %42 = vector.broadcast %cst_30 : f32 to vector<32x128xf32>
    %43 = arith.select %41, %37, %42 : vector<32x128xi1>, vector<32x128xf32>
    %44 = arith.addf %34, %43 : vector<32x128xf32>
    %c0_31 = arith.constant 0 : index
    %c3_32 = arith.constant 3 : index
    %c0_33 = arith.constant 0 : index
    %c0_34 = arith.constant 0 : index
    %45 = vector.load %arg2[%c0_31, %c3_32, %c0_33, %c0_34] : memref<1x4x32x128xf32, #tpu.memory_space<vmem>>, vector<1x1x32x128xf32>
    %46 = vector.shape_cast %45 : vector<1x1x32x128xf32> to vector<32x128xf32>
    %47 = arith.subf %46, %12 : vector<32x128xf32>
    %48 = math.exp %47 : vector<32x128xf32>
    %49 = arith.addf %39, %48 : vector<32x128xf32>
    %c3_i32 = arith.constant 3 : i32
    %50 = vector.broadcast %c3_i32 : i32 to vector<32x128xi32>
    %51 = arith.cmpi eq, %1, %50 : vector<32x128xi32>
    %cst_35 = arith.constant 0.000000e+00 : f32
    %52 = vector.broadcast %cst_35 : f32 to vector<32x128xf32>
    %53 = arith.select %51, %47, %52 : vector<32x128xi1>, vector<32x128xf32>
    %54 = arith.addf %44, %53 : vector<32x128xf32>
    %55 = tpu.iota {dimensions = array<i32: 0>} : vector<32x128xi32>
    %c32_i32 = arith.constant 32 : i32
    %56 = arith.muli %arg1, %c32_i32 : i32
    %57 = vector.broadcast %56 : i32 to vector<32x128xi32>
    %58 = arith.addi %57, %55 : vector<32x128xi32>
    %c32_i32_36 = arith.constant 32 : i32
    %59 = vector.broadcast %c32_i32_36 : i32 to vector<32x128xi32>
    %60 = arith.cmpi slt, %58, %59 : vector<32x128xi32>
    %c0_i32_37 = arith.constant 0 : i32
    %61 = vector.broadcast %c0_i32_37 : i32 to vector<32x128xi32>
    %62 = arith.cmpi sge, %1, %61 : vector<32x128xi32>
    %c4_i32 = arith.constant 4 : i32
    %63 = vector.broadcast %c4_i32 : i32 to vector<32x128xi32>
    %64 = arith.cmpi slt, %1, %63 : vector<32x128xi32>
    %65 = arith.andi %62, %64 : vector<32x128xi1>
    %66 = arith.andi %65, %60 : vector<32x128xi1>
    %67 = math.log %49 : vector<32x128xf32>
    %68 = arith.subf %67, %54 : vector<32x128xf32>
    %cst_38 = arith.constant 0.000000e+00 : f32
    %69 = vector.broadcast %cst_38 : f32 to vector<32x128xf32>
    %70 = arith.select %66, %68, %69 : vector<32x128xi1>, vector<32x128xf32>
    %71 = vector.shape_cast %70 : vector<32x128xf32> to vector<1x32x128xf32>
    %cst_39 = arith.constant dense<0.000000e+00> : vector<1xf32>
    %72 = vector.multi_reduction <add>, %71, %cst_39 [1, 2] : vector<1x32x128xf32> to vector<1xf32>
    %73 = vector.shape_cast %72 : vector<1xf32> to vector<1x1x1xf32>
    %74 = vector.extract %73[0, 0, 0] : f32 from vector<1x1x1xf32>
    %cst_40 = arith.constant 1.000000e+00 : f32
    %cst_41 = arith.constant 0.000000e+00 : f32
    %75 = vector.broadcast %cst_40 : f32 to vector<32x128xf32>
    %76 = vector.broadcast %cst_41 : f32 to vector<32x128xf32>
    %77 = arith.select %66, %75, %76 : vector<32x128xi1>, vector<32x128xf32>
    %78 = vector.shape_cast %77 : vector<32x128xf32> to vector<1x32x128xf32>
    %cst_42 = arith.constant dense<0.000000e+00> : vector<1xf32>
    %79 = vector.multi_reduction <add>, %78, %cst_42 [1, 2] : vector<1x32x128xf32> to vector<1xf32>
    %80 = vector.shape_cast %79 : vector<1xf32> to vector<1x1x1xf32>
    %81 = vector.extract %80[0, 0, 0] : f32 from vector<1x1x1xf32>
    %82 = tpu.iota {dimensions = array<i32: 0>} : vector<8x128xi32>
    %c0_i32_43 = arith.constant 0 : i32
    %83 = vector.broadcast %c0_i32_43 : i32 to vector<8x128xi32>
    %84 = arith.cmpi eq, %82, %83 : vector<8x128xi32>
    %85 = vector.broadcast %74 : f32 to vector<8x128xf32>
    %86 = vector.broadcast %81 : f32 to vector<8x128xf32>
    %87 = arith.select %84, %85, %86 : vector<8x128xi1>, vector<8x128xf32>
    %c0_44 = arith.constant 0 : index
    %c0_45 = arith.constant 0 : index
    %c0_46 = arith.constant 0 : index
    %c0_47 = arith.constant 0 : index
    %88 = vector.load %arg4[%c0_44, %c0_45, %c0_46, %c0_47] : memref<1x1x8x128xf32, #tpu.memory_space<vmem>>, vector<1x1x8x128xf32>
    %89 = vector.shape_cast %88 : vector<1x1x8x128xf32> to vector<8x128xf32>
    %90 = vector.shape_cast %87 : vector<8x128xf32> to vector<1x1x8x128xf32>
    tpu.vector_store %arg4[%c0_44, %c0_45, %c0_46, %c0_47], %90 {strides = array<i32>} : memref<1x1x8x128xf32, #tpu.memory_space<vmem>>, vector<1x1x8x128xf32>,
    return
  }
  func.func @transform_0(%arg0: i32, %arg1: i32) -> (i32, i32, i32, i32) {
    %c0_i32 = arith.constant 0 : i32
    %c0_i32_0 = arith.constant 0 : i32
    %c0_i32_1 = arith.constant 0 : i32
    return %arg0, %c0_i32, %arg1, %c0_i32_0 : i32, i32, i32, i32
  }
  func.func @transform_1(%arg0: i32, %arg1: i32) -> (i32, i32, i32) {
    %c0_i32 = arith.constant 0 : i32
    %c0_i32_0 = arith.constant 0 : i32
    return %arg0, %arg1, %c0_i32 : i32, i32, i32
  }
  func.func @transform_2(%arg0: i32, %arg1: i32) -> (i32, i32, i32, i32) {
    %c0_i32 = arith.constant 0 : i32
    %c0_i32_0 = arith.constant 0 : i32
    %c0_i32_1 = arith.constant 0 : i32
    return %arg0, %arg1, %c0_i32, %c0_i32_0 : i32, i32, i32, i32
  }
}

</mosaic_0001>

<bundles_post_ra>
// kernel: tpu_custom_call.1
= control target key start
LH: loop header
LB: loop body
LE: loop exit
PB: predicated region body
PF: predicated region fallthrough
CT: control target
= control target key end

     0   :  { %7 = vsyncpa [#allocation3], 0  ;;  %s1202_s0 = inlined_call_operand.hbm [shape: f32[2,4,32,128], index: 0, kind: input, shape index: {}]   ;;  %s1203_s1 = inlined_call_operand.hbm [shape: s32[2,32,128], index: 1, kind: input, shape index: {}]   ;;  %s1204_s2 = inlined_call_operand.hbm [shape: f32[2,1,8,128], index: 2, kind: output, shape index: {}]  }
   0x1   :  { %9 = vsyncpa [#allocation3 + $0x1], 0 }
   0x2   :  { %10 = vsyncpa [#allocation6], 0 }
   0x3   :  { %12 = vsyncpa [#allocation6 + $0x1], 0 }
   0x4   :  { %13 = vsyncpa [#allocation4], 0 }
   0x5   :  { %15 = vsyncpa [#allocation4 + $0x1], 0  ;;  %s885_s9 = smov 0   ;;  %s887_s10 = smov 0  }
   0x6   :  { %s889_s11 = smov 0   ;;  %s891_s12 = smov 0  }
   0x7   :  { %s893_s13 = smov 0   ;;  %s895_s14 = smov 0  }
   0x8 LB: > { %s576_s15 = sadd.s32 4294967295, %s862_s14   ;;  %s577_s16 = sadd.s32 4294967294, %s862_s14   ;;  %s862_s14 = sphi %s895_s14, %s21_s14   ;;  %s858_s13 = sphi %s893_s13, %s1219_s13   ;;  %s854_s12 = sphi %s891_s12, %s1218_s12   ;;  %s850_s11 = sphi %s889_s11, %s1217_s11   ;;  %s846_s10 = sphi %s887_s10, %s1216_s10   ;;  %s842_s9 = sphi %s885_s9, %s1215_s9  }
   0x9   : > { %s33_s17 = sadd.s32 1, %s858_s13  ;;  %s42_s18 = sadd.s32 1, %s850_s11 }
   0xa   : > { %p35_p0 = scmp.ge.s32.totalorder %s33_s17, 2  ;;  %p49_p1 = scmp.ne.s32.totalorder %s850_s11, %s846_s10 }
   0xb   : > { %p50_p2 = scmp.eq.s32.totalorder %s862_s14, 0  ;;  %p55_p3 = scmp.ne.s32.totalorder %s846_s10, %s842_s9 }
   0xc   : > { %s1221_s17 = smov (%p35_p0, %s33_s17), 0  ;;  %p56_p5 = scmp.eq.s32.totalorder %s576_s15, 0 }
   0xd   : > { %p926_p4 = por %p50_p2, %p49_p1  ;;  %s37_s20 = ssub.s32 %s858_s13, %s1221_s17 }
   0xe   : > { %p109_p6 = scmp.eq.s32.totalorder %s576_s15, 1  ;;  %p40_p7 = scmp.eq.s32.totalorder %s37_s20, 0 }
   0xf   : > { %p932_p8 = por %p56_p5, %p55_p3  ;;  %p115_p10 = scmp.eq.s32.totalorder %s577_s16, 1 }
  0x10   : > { %p936_p9 = por %p109_p6, %p49_p1  ;;  %p579_p12 = scmp.ge.s32.totalorder %s862_s14, 2 }
  0x11   : > { %s941_s23 = scalar_select %p40_p7, %s850_s11, %s42_s18  }
  0x12   : > { %p943_p11 = por %p115_p10, %p55_p3  ;;  %p629_p13 = scmp.lt.s32.totalorder %s862_s14, 2 }
  0x13   : > { %s950_s25 = sand.u32 1, %s850_s11   ;;  %s606_s27 = sshll.u32 %s858_s13, 11 }
  0x14   : > { %s580_s26 = sshll.u32 %s950_s25, 7  ;;  %s147_s30 = scalar_lea.hbm %s1202_s0, %s606_s27 }
  0x15   : > { %s139_s3 = scalar_lea.vmem [#allocation2], %s580_s26  ;;  %p959_p0 = pnand %p629_p13, %p926_p4 }
  0x16   : > { %s148_s4 = sshll.u32 %s139_s3, 4  ;;  %p586_p1 = scmp.ge.s32.totalorder %s862_s14, 1  ;;  %s149_s4 = int_to_ptr.vmem [resolvable:$true] %s148_s4 }
  0x17   : > { %s136_s6 = scalar_lea.sflag [#allocation3], %s950_s25  ;;  %p724_p2 = pneg %p959_p0 }
  0x18   : > { %s735_s7 = scalar_lea.vmem %s149_s4, 2048  ;;  %s864_s8 = smov [#allocation2]  }
  0x19   : > { %p736_p3 = scmp.ne.s32.totalorder %s149_s4, %s735_s7  ;;  %s740_s15 = sshll.u32 %s864_s8, 4  ;;  %s741_s15 = int_to_ptr.vmem [resolvable:$false] %s740_s15 }
  0x1a   : > { %s742_s16 = scalar_lea.vmem %s741_s15, 4096  ;;  %p743_p4 = scmp.lt.s32.totalorder %s149_s4, %s741_s15 }
  0x1b   : > { %p738_p5 = pnand %p736_p3, %p724_p2  ;;  %p744_p7 = scmp.lt.s32.totalorder %s742_s16, %s735_s7 }
  0x1d   : > { %p739_p6 = pneg %p738_p5  ;;  %p745_p10 = por %p744_p7, %p743_p4 }
  0x1f   : > { %p746_p13 = pnand %p745_p10, %p739_p6 }
  0x21   : > { %749 = shalt.err (!%p746_p13)
}
  0x22   : > { %s865_s18 = smov 128   ;;  %s866_s19 = smov 8  }
  0x23   : > { %621 = dma.hbm_to_vmem [thread:$0]  (!%p959_p0), %s147_s30, 2048, %s149_s4, %s136_s6, %s865_s18, %s865_s18, %s866_s19  }
  0x24   : > { %p179_p3 = scmp.lt.s32.totalorder %s862_s14, 3  ;;  %s583_s20 = sshll.u32 %s950_s25, 5 }
  0x25   : > { %s607_s26 = sshll.u32 %s858_s13, 9  ;;  %s162_s7 = scalar_lea.vmem [#allocation5], %s583_s20 }
  0x26   : > { %p977_p5 = pnand %p586_p1, %p179_p3  ;;  %s170_s3 = scalar_lea.hbm %s1203_s1, %s607_s26 }
  0x27   : > { %s171_s8 = sshll.u32 %s162_s7, 4  ;;  %s159_s15 = scalar_lea.sflag [#allocation6], %s950_s25  ;;  %s172_s8 = int_to_ptr.vmem [resolvable:$true] %s171_s8 }
  0x28   : > { %s763_s16 = scalar_lea.vmem %s172_s8, 512  ;;  %s867_s30 = smov [#allocation5]  }
  0x29   : > { %p764_p6 = scmp.ne.s32.totalorder %s172_s8, %s763_s16  ;;  %s768_s4 = sshll.u32 %s867_s30, 4  ;;  %s769_s4 = int_to_ptr.vmem [resolvable:$false] %s768_s4 }
  0x2a   : > { %s770_s6 = scalar_lea.vmem %s769_s4, 1024  ;;  %p771_p1 = scmp.lt.s32.totalorder %s172_s8, %s769_s4 }
  0x2b   : > { %p766_p4 = pnand %p764_p6, %p724_p2  ;;  %p772_p10 = scmp.lt.s32.totalorder %s770_s6, %s763_s16 }
  0x2d   : > { %p767_p7 = pneg %p766_p4  ;;  %p773_p13 = por %p772_p10, %p771_p1 }
  0x2f   : > { %p774_p3 = pnand %p773_p13, %p767_p7 }
  0x31   : > { %777 = shalt.err (!%p774_p3)
}
  0x32   : > { %624 = dma.hbm_to_vmem [thread:$0]  (!%p959_p0), %s170_s3, 512, %s172_s8, %s159_s15, %s865_s18, %s865_s18, %s866_s19  }
  0x33   : > { %183 = sbr.rel (%p977_p5) target bundleno = 345 (0x159), region = 28  ;;  %s993_s25 = sand.u32 (!%p977_p5), 1, %s846_s10  }
  0x34   : > { %s587_s20 = sshll.u32 (!%p977_p5), %s993_s25, 7  ;;  %s186_s26 = scalar_lea.sflag (!%p977_p5), [#allocation3], %s993_s25 }
  0x35   : > { %s997_s28 = scalar_lea.vmem (!%p977_p5), [#allocation2], %s587_s20 }
  0x38   : > { %829 = dma.done.wait (%p932_p8), %s186_s26, 2048  }
  0x39   : > { %831 = vsyncadd (%p932_p8), %s186_s26, 4294965248  ;;  %s588_s5 = sshll.u32 %s993_s25, 5  ;;  %s195_s18 = scalar_lea.sflag [#allocation6], %s993_s25 }
  0x3a   : > { %s1005_s19 = scalar_lea.vmem [#allocation5], %s588_s5 }
  0x3b   : > { %833 = dma.done.wait (%p932_p8), %s195_s18, 512  }
  0x3c   : > { %835 = vsyncadd (%p932_p8), %s195_s18, 4294966784  ;;  %v230_v0 = vld [vmem:[%s997_s28] sm:$0xff]  ;;  %v231_v1 = vld [vmem:[%s997_s28 + $0x8] sm:$0xff]  ;;  %s589_s21 = sshll.u32 %s993_s25, 3  ;;  %s603_s27 = sshll.u32 %s854_s12, 7 }
  0x3d   : > { %v232_v2 = vld [vmem:[%s997_s28 + $0x10] sm:$0xff]  ;;  %v233_v3 = vld [vmem:[%s997_s28 + $0x18] sm:$0xff]  ;;  %v590_v4 = vld [vmem:[%s997_s28 + $0x20] sm:$0xff]  ;;  %s223_s3 = scalar_lea.vmem [#allocation7], %s589_s21  ;;  %s1160_s30 = scalar_lea.hbm %s1204_s2, %s603_s27 }
  0x3e   : > { %v591_v5 = vld [vmem:[%s997_s28 + $0x28] sm:$0xff]  ;;  %v592_v6 = vld [vmem:[%s997_s28 + $0x30] sm:$0xff]  ;;  %v593_v7 = vld [vmem:[%s997_s28 + $0x38] sm:$0xff]  ;;  %v239_v8 = vmax.f32 %v230_v0, %v590_v4  ;;  %s468_s7 = sshll.u32 %s223_s3, 4  ;;  %s454_s4 = scalar_lea.sflag [#allocation4], %s993_s25  ;;  %s469_s7 = int_to_ptr.vmem [resolvable:$true] %s468_s7 }
  0x3f   : > { %v240_v9 = vmax.f32 %v231_v1, %v591_v5  ;;  %v241_v10 = vmax.f32 %v232_v2, %v592_v6  ;;  %v242_v11 = vmax.f32 %v233_v3, %v593_v7  ;;  %v594_v12 = vld [vmem:[%s997_s28 + $0x40] sm:$0xff]  ;;  %v595_v13 = vld [vmem:[%s997_s28 + $0x48] sm:$0xff]  ;;  %v596_v14 = vld [vmem:[%s997_s28 + $0x50] sm:$0xff]  ;;  %s778_s6 = scalar_lea.vmem %s469_s7, 128  ;;  %s869_s12 = smov [#allocation7]  }
  0x40   : > { %v597_v15 = vld [vmem:[%s997_s28 + $0x58] sm:$0xff]  ;;  %v248_v16 = vmax.f32 %v239_v8, %v594_v12  ;;  %v598_v17 = vld [vmem:[%s997_s28 + $0x60] sm:$0xff]  ;;  %v599_v18 = vld [vmem:[%s997_s28 + $0x68] sm:$0xff]  ;;  %p779_p8 = scmp.ne.s32.totalorder %s469_s7, %s778_s6  ;;  %s782_s20 = sshll.u32 %s869_s12, 4  ;;  %s783_s20 = int_to_ptr.vmem [resolvable:$false] %s782_s20 }
  0x41   : > { %v249_v19 = vmax.f32 %v240_v9, %v595_v13  ;;  %v250_v20 = vmax.f32 %v241_v10, %v596_v14  ;;  %v251_v21 = vmax.f32 %v242_v11, %v597_v15  ;;  %v600_v22 = vld [vmem:[%s997_s28 + $0x70] sm:$0xff]  ;;  %v601_v23 = vld [vmem:[%s997_s28 + $0x78] sm:$0xff]  ;;  %v1076_v8 = vld [vmem:[%s1005_s19] sm:$0xff]  ;;  %s784_s26 = scalar_lea.vmem %s783_s20, 256  ;;  %p785_p5 = scmp.lt.s32.totalorder %s469_s7, %s783_s20 }
  0x42   : > { %v257_v24 = vmax.f32 %v248_v16, %v598_v17  ;;  %v1079_v11 = vld [vmem:[%s1005_s19 + $0x8] sm:$0xff]  ;;  %vm277_vm0 = vcmp.eq.s32.totalorder %v1076_v8, 0  ;;  %vm305_vm4 = vcmp.eq.s32.totalorder %v1076_v8, 1  ;;  %vm333_vm8 = vcmp.eq.s32.totalorder %v1076_v8, 2  ;;  %p780_p0 = pnand %p779_p8, %p936_p9  ;;  %p786_p6 = scmp.lt.s32.totalorder %s784_s26, %s778_s6 }
  0x43   : > { %v258_v25 = vmax.f32 %v249_v19, %v599_v18  ;;  %v259_v26 = vmax.f32 %v250_v20, %v600_v22  ;;  %v260_v27 = vmax.f32 %v251_v21, %v601_v23  ;;  %vm278_vm1 = vcmp.eq.s32.totalorder %v1079_v11, 0 }
  0x44   : > { %v1027_v28 = vsub.f32 %v230_v0, %v257_v24  ;;  %v1029_v29 = vsub.f32 %v590_v4, %v257_v24  ;;  %v1049_v42 = vsub.f32 %v594_v12, %v257_v24  ;;  %v1061_v50 = vsub.f32 %v598_v17, %v257_v24  ;;  %v1082_v12 = vld [vmem:[%s1005_s19 + $0x10] sm:$0xff]  ;;  %p781_p2 = pneg %p780_p0  ;;  %p787_p4 = por %p786_p6, %p785_p5 }
  0x45   : > { %v1031_v30 = vsub.f32 %v231_v1, %v258_v25  ;;  %v1033_v31 = vsub.f32 %v232_v2, %v259_v26  ;;  %v1035_v32 = vsub.f32 %v233_v3, %v260_v27  ;;  %v1037_v33 = vsub.f32 %v591_v5, %v258_v25 }
  0x46   : > { %v265_v34 = vmul.f32 1.442695, %v1027_v28  ;;  %v1040_v35 = vsub.f32 %v592_v6, %v259_v26  ;;  %v1045_v39 = vsub.f32 %v593_v7, %v260_v27  ;;  %v293_v40 = vmul.f32 1.442695, %v1029_v29  ;;  %p788_p7 = pnand %p787_p4, %p781_p2 }
  0x47   : > { %v267_v36 = vmul.f32 1.442695, %v1031_v30  ;;  %v269_v37 = vmul.f32 1.442695, %v1033_v31  ;;  %v271_v38 = vmul.f32 1.442695, %v1035_v32  ;;  %v1052_v44 = vsub.f32 %v595_v13, %v258_v25 }
  0x48   : > { %682 = vpow2.f32 %v265_v34  ;;  %v295_v41 = vmul.f32 1.442695, %v1037_v33  ;;  %v297_v43 = vmul.f32 1.442695, %v1040_v35  ;;  %v299_v45 = vmul.f32 1.442695, %v1045_v39 }
  0x49   : > { %684 = vpow2.f32 %v267_v36  ;;  %v1055_v46 = vsub.f32 %v596_v14, %v259_v26  ;;  %v1057_v47 = vsub.f32 %v597_v15, %v260_v27  ;;  %v321_v48 = vmul.f32 1.442695, %v1049_v42  ;;  %v1085_v13 = vld [vmem:[%s1005_s19 + $0x18] sm:$0xff] }
  0x4a   : > { %686 = vpow2.f32 %v269_v37  ;;  %v323_v49 = vmul.f32 1.442695, %v1052_v44  ;;  %v1065_v53 = vsub.f32 %v599_v18, %v258_v25  ;;  %v1067_v54 = vsub.f32 %v600_v22, %v259_v26 }
  0x4b   : > { %688 = vpow2.f32 %v271_v38  ;;  %v325_v51 = vmul.f32 1.442695, %v1055_v46  ;;  %v327_v52 = vmul.f32 1.442695, %v1057_v47  ;;  %v1069_v55 = vsub.f32 %v601_v23, %v260_v27 }
  0x4c   : > { %690 = vpow2.f32 %v293_v40  ;;  %v349_v56 = vmul.f32 1.442695, %v1061_v50  ;;  %v351_v57 = vmul.f32 1.442695, %v1065_v53  ;;  %v353_v58 = vmul.f32 1.442695, %v1067_v54 }
  0x4d   : > { %692 = vpow2.f32 %v295_v41  ;;  %v355_v59 = vmul.f32 1.442695, %v1069_v55  ;;  %vm279_vm2 = vcmp.eq.s32.totalorder %v1082_v12, 0  ;;  %vm280_vm3 = vcmp.eq.s32.totalorder %v1085_v13, 0 }
  0x4e   : > { %694 = vpow2.f32 %v297_v43  ;;  %vm306_vm5 = vcmp.eq.s32.totalorder %v1079_v11, 1  ;;  %vm307_vm6 = vcmp.eq.s32.totalorder %v1082_v12, 1  ;;  %v281_v24 = vsel %vm277_vm0, %v1027_v28, 0.0 }
  0x4f   : > { %696 = vpow2.f32 %v299_v45  ;;  %vm308_vm7 = vcmp.eq.s32.totalorder %v1085_v13, 1  ;;  %v282_v27 = vsel %vm278_vm1, %v1031_v30, 0.0  ;;  %v283_v34 = vsel %vm279_vm2, %v1033_v31, 0.0 }
  0x50   : > { %698 = vpow2.f32 %v321_v48  ;;  %v284_v37 = vsel %vm280_vm3, %v1035_v32, 0.0  ;;  %v309_v38 = vsel %vm305_vm4, %v1029_v29, 0.0  ;;  %v310_v28 = vsel %vm306_vm5, %v1037_v33, 0.0 }
  0x51   : > { %700 = vpow2.f32 %v323_v49  ;;  %v311_v30 = vsel %vm307_vm6, %v1040_v35, 0.0  ;;  %v312_v31 = vsel %vm308_vm7, %v1045_v39, 0.0  ;;  %vm334_vm9 = vcmp.eq.s32.totalorder %v1079_v11, 2 }
  0x52   : > { %702 = vpow2.f32 %v325_v51  ;;  %vm335_vm10 = vcmp.eq.s32.totalorder %v1082_v12, 2  ;;  %vm336_vm11 = vcmp.eq.s32.totalorder %v1085_v13, 2  ;;  %v313_v29 = vadd.f32 %v309_v38, %v281_v24 }
  0x53   : > { %704 = vpow2.f32 %v327_v52  ;;  %v314_v32 = vadd.f32 %v310_v28, %v282_v27  ;;  %v315_v41 = vadd.f32 %v311_v30, %v283_v34  ;;  %v316_v43 = vadd.f32 %v312_v31, %v284_v37 }
  0x54   : > { %706 = vpow2.f32 %v349_v56  ;;  %v337_v33 = vsel %vm333_vm8, %v1049_v42, 0.0  ;;  %v338_v35 = vsel %vm334_vm9, %v1052_v44, 0.0  ;;  %v339_v39 = vsel %vm335_vm10, %v1055_v46, 0.0 }
  0x55   : > { %v683_v60 = vpop.eup %682  ;;  %708 = vpow2.f32 %v351_v57  ;;  %v340_v45 = vsel %vm336_vm11, %v1057_v47, 0.0  ;;  %vm361_vm12 = vcmp.eq.s32.totalorder %v1076_v8, 3  ;;  %vm362_vm13 = vcmp.eq.s32.totalorder %v1079_v11, 3 }
  0x56   : > { %v685_v61 = vpop.eup %684  ;;  %710 = vpow2.f32 %v353_v58  ;;  %vm363_vm14 = vcmp.eq.s32.totalorder %v1082_v12, 3  ;;  %vm364_vm15 = vcmp.eq.s32.totalorder %v1085_v13, 3  ;;  %v341_v48 = vadd.f32 %v337_v33, %v313_v29 }
  0x57   : > { %v687_v62 = vpop.eup %686  ;;  %712 = vpow2.f32 %v355_v59  ;;  %vm388_vm0 = vcmp.ge.s32.totalorder %v1076_v8, 0  ;;  %v342_v49 = vadd.f32 %v338_v35, %v314_v32  ;;  %v343_v51 = vadd.f32 %v339_v39, %v315_v41 }
  0x58   : > { %v689_v63 = vpop.eup %688  ;;  %v344_v42 = vadd.f32 %v340_v45, %v316_v43  ;;  %v365_v44 = vsel %vm361_vm12, %v1061_v50, 0.0  ;;  %v366_v46 = vsel %vm362_vm13, %v1065_v53, 0.0  ;;  %v367_v47 = vsel %vm363_vm14, %v1067_v54, 0.0 }
  0x59   : > { %v691_v0 = vpop.eup %690  ;;  %v368_v52 = vsel %vm364_vm15, %v1069_v55, 0.0  ;;  %vm392_vm1 = vcmp.lt.s32.totalorder %v1076_v8, 4  ;;  %vm389_vm2 = vcmp.ge.s32.totalorder %v1079_v11, 0  ;;  %vm393_vm3 = vcmp.lt.s32.totalorder %v1079_v11, 4 }
  0x5a   : > { %v693_v1 = vpop.eup %692  ;;  %v301_v2 = vadd.f32 %v691_v0, %v683_v60  ;;  %v369_v56 = vadd.f32 %v365_v44, %v341_v48  ;;  %v370_v58 = vadd.f32 %v366_v46, %v342_v49  ;;  %v371_v59 = vadd.f32 %v367_v47, %v343_v51  ;;  %vm1133_vm4 = vmand %vm388_vm0, %vm392_vm1 }
  0x5b   : > { %v695_v3 = vpop.eup %694  ;;  %v302_v4 = vadd.f32 %v693_v1, %v685_v61  ;;  %v372_v60 = vadd.f32 %v368_v52, %v344_v42  ;;  %vm390_vm5 = vcmp.ge.s32.totalorder %v1082_v12, 0  ;;  %vm391_vm6 = vcmp.ge.s32.totalorder %v1085_v13, 0  ;;  %vm1140_vm8 = vmand %vm389_vm2, %vm393_vm3 }
  0x5c   : > { %v697_v5 = vpop.eup %696  ;;  %v303_v6 = vadd.f32 %v695_v3, %v687_v62  ;;  %vm394_vm7 = vcmp.lt.s32.totalorder %v1082_v12, 4  ;;  %vm395_vm9 = vcmp.lt.s32.totalorder %v1085_v13, 4  ;;  %v373_v31 = vlaneseq }
  0x5d   : > { %v699_v7 = vpop.eup %698  ;;  %v304_v9 = vadd.f32 %v697_v5, %v689_v63  ;;  %v868_v63 = vmov 0.0   ;;  %vm398_vm10 = vmand %vm390_vm5, %vm394_vm7 }
  0x5e   : > { %v701_v10 = vpop.eup %700  ;;  %v329_v14 = vadd.f32 %v699_v7, %v301_v2  ;;  %v432_v0 = vsel %vm1133_vm4, 1.0, %v868_v63  ;;  %v433_v1 = vsel %vm1140_vm8, 1.0, %v868_v63  ;;  %vm399_vm11 = vmand %vm391_vm6, %vm395_vm9  ;;  %v434_v12 = vsel %vm398_vm10, 1.0, %v868_v63 }
  0x5f   : > { %v703_v15 = vpop.eup %702  ;;  %v330_v16 = vadd.f32 %v701_v10, %v302_v4  ;;  %v374_v29 = vshrl.u32 %v373_v31, 7 }
  0x60   : > { %v705_v17 = vpop.eup %704  ;;  %v331_v18 = vadd.f32 %v703_v15, %v303_v6 }
  0x61   : > { %v707_v19 = vpop.eup %706  ;;  %v332_v20 = vadd.f32 %v705_v17, %v304_v9  ;;  %v436_v9 = vadd.f32 %v433_v1, %v432_v0  ;;  %vm448_vm12 = vcmp.eq.s32.totalorder %v374_v29, 0 }
  0x62   : > { %v709_v21 = vpop.eup %708  ;;  %v357_v22 = vadd.f32 %v707_v19, %v329_v14  ;;  %v435_v19 = vsel %vm399_vm11, 1.0, %v868_v63 }
  0x63   : > { %v711_v23 = vpop.eup %710  ;;  %v358_v25 = vadd.f32 %v709_v21, %v330_v16 }
  0x64   : > { %v713_v26 = vpop.eup %712  ;;  %v359_v36 = vadd.f32 %v711_v23, %v331_v18  ;;  %714 = vlog2.f32 %v357_v22  ;;  %v437_v18 = vadd.f32 %v436_v9, %v434_v12 }
  0x65   : > { %v360_v40 = vadd.f32 %v713_v26, %v332_v20  ;;  %716 = vlog2.f32 %v358_v25 }
  0x66   : > { %718 = vlog2.f32 %v359_v36  ;;  %v438_v13 = vadd.f32 %v437_v18, %v435_v19 }
  0x67   : > { %720 = vlog2.f32 %v360_v40 }
  0x71   : > { %v715_v57 = vpop.eup %714 }
  0x72   : > { %v717_v53 = vpop.eup %716  ;;  %v405_v55 = vmul.f32 0.6931472, %v715_v57 }
  0x73   : > { %v719_v61 = vpop.eup %718  ;;  %v407_v62 = vmul.f32 0.6931472, %v717_v53 }
  0x74   : > { %v721_v2 = vpop.eup %720  ;;  %v409_v3 = vmul.f32 0.6931472, %v719_v61  ;;  %v412_v4 = vsub.f32 %v405_v55, %v369_v56 }
  0x75   : > { %v411_v5 = vmul.f32 0.6931472, %v721_v2  ;;  %v413_v6 = vsub.f32 %v407_v62, %v370_v58 }
  0x76   : > { %v414_v7 = vsub.f32 %v409_v3, %v371_v59  ;;  %v416_v8 = vsel %vm1133_vm4, %v412_v4, 0.0 }
  0x77   : > { %v415_v10 = vsub.f32 %v411_v5, %v372_v60  ;;  %v417_v11 = vsel %vm1140_vm8, %v413_v6, 0.0 }
  0x78   : > { %v418_v14 = vsel %vm398_vm10, %v414_v7, 0.0  ;;  %v420_v15 = vadd.f32 %v417_v11, %v416_v8 }
  0x79   : > { %v419_v16 = vsel %vm399_vm11, %v415_v10, 0.0 }
  0x7a   : > { %v421_v17 = vadd.f32 %v420_v15, %v418_v14 }
  0x7c   : > { %v422_v20 = vadd.f32 %v421_v17, %v419_v16 }
  0x7e   : > { %423 = vadd.xlane.f32.xlu0 %v422_v20 }
  0x82   : > { %439 = vadd.xlane.f32.xlu0 %v438_v13 }
 0x107   : > { %v424_v21 = vpop.xlane.xlu0 %423 }
 0x108   : > { %v425_v22 = vrot.slane %v424_v21, 4 }
 0x10a   : > { %v426_v23 = vadd.f32 %v425_v22, %v424_v21 }
 0x10b   : > { %v440_v24 = vpop.xlane.xlu0 %439 }
 0x10c   : > { %v427_v25 = vrot.slane %v426_v23, 2  ;;  %v441_v26 = vrot.slane %v440_v24, 4 }
 0x10e   : > { %v442_v27 = vadd.f32 %v441_v26, %v440_v24  ;;  %v428_v34 = vadd.f32 %v427_v25, %v426_v23 }
 0x110   : > { %v443_v36 = vrot.slane %v442_v27, 2  ;;  %v429_v37 = vrot.slane %v428_v34, 1 }
 0x112   : > { %v444_v38 = vadd.f32 %v443_v36, %v442_v27  ;;  %v430_v40 = vadd.f32 %v429_v37, %v428_v34 }
 0x114   : > { %608 = vpush %v430_v40  ;;  %v445_v28 = vrot.slane %v444_v38, 1 }
 0x116   : > { %v446_v30 = vadd.f32 %v445_v28, %v444_v38 }
 0x118   : > { %610 = vpush %v446_v30 }
 0x145   : > { %s609_s29 = spop %608 }
 0x146   : > { %v449_v32 = vstv %s609_s29 }
 0x149   : > { %s611_s8 = spop %610 }
 0x14a   : > { %v450_v41 = vstv %s611_s8 }
 0x14b   : > { %v451_v43 = vsel %vm448_vm12, %v449_v32, %v450_v41 }
 0x14c   : > { %452 = vst [vmem:[%s223_s3] sm:$0xff] %v451_v43 }
 0x14d   : > { %791 = shalt.err (!%p788_p7)
}
 0x14e   : > { %s792_s28 = scalar_lea.hbm %s1160_s30, 128  ;;  %s796_s18 = scalar_lea.hbm %s1204_s2, 256 }
 0x14f   : > { %p793_p1 = scmp.ne.s32.totalorder %s1160_s30, %s792_s28  ;;  %p797_p3 = scmp.lt.s32.totalorder %s1160_s30, %s1204_s2 }
 0x150   : > { %p798_p8 = scmp.lt.s32.totalorder %s796_s18, %s792_s28 }
 0x151   : > { %p794_p10 = pnand %p793_p1, %p936_p9 }
 0x152   : > { %p799_p0 = por %p798_p8, %p797_p3 }
 0x153   : > { %p795_p13 = pneg %p794_p10 }
 0x155   : > { %p800_p2 = pnand %p799_p0, %p795_p13 }
 0x157   : > { %803 = shalt.err (!%p800_p2)
}
 0x158   : > { %616 = dma.vmem_to_hbm [thread:$0]  (%p936_p9), %s469_s7, 128, %s1160_s30, %s454_s4  }
 0x159 PF: > { %s480_s27 = sand.u32 1, %s842_s9   ;;  %p626_p5 = pnand %p579_p12, %p943_p11 }
 0x15a   : > { %s481_s29 = scalar_lea.sflag [#allocation4], %s480_s27 }
 0x15b   : > { %p627_p6 = pneg %p626_p5 }
 0x15d   : > { %837 = dma.done.wait (%p627_p6), %s481_s29, 128  }
 0x15e   : > { %839 = vsyncadd (%p627_p6), %s481_s29, 4294967168  ;;  %s21_s14 = sadd.s32 1, %s862_s14   ;;  %s1215_s9 = smov %s846_s10 }
 0x15f   : > { %p18_p4 = scmp.ge.s32.totalorder %s21_s14, 4   ;;  %s1216_s10 = smov %s850_s11 }
 0x160   : > { %s1217_s11 = smov %s941_s23  ;;  %s1218_s12 = smov %s858_s13 }
 0x161   : > { %s1219_s13 = smov %s1221_s17  ;;  %20 = sbr.rel (!%p18_p4) target bundleno = 8 (0x8), region = 89 }
 0x166   :  { %486 = vsyncpa [#allocation3], 1 }
 0x167   :  { %488 = vsyncpa [#allocation3 + $0x1], 1 }
 0x168   :  { %489 = vsyncpa [#allocation6], 1 }
 0x169   :  { %491 = vsyncpa [#allocation6 + $0x1], 1 }
 0x16a   :  { %492 = vsyncpa [#allocation4], 1 }
 0x16b   :  { %494 = vsyncpa [#allocation4 + $0x1], 1 }

</bundles_post_ra>
